<compile_context>
chip_gen: v7x
topology: tpu7x:2x2x1
jax: 0.10.0
libtpu: 0.0.40
codegen_flags: <defaults>
</compile_context>

<pallas_src>
import functools

import jax
import jax.numpy as jnp
from jax.experimental import pallas as pl
from jax.experimental.pallas import tpu as pltpu


def _round_up(x: int, m: int) -> int:
    return ((x + m - 1) // m) * m


def _vmem_capacity_bytes() -> int:
    try:
        return int(pltpu.get_tpu_info().vmem_capacity_bytes)
    except Exception:
        return 64 << 20          # v7x physical VMEM: the safe lower bound


def _block_spec(shape, index_map, *, single_buffer=False):
    """BlockSpec helper; single_buffer=True requests 1-deep buffering for
    index-invariant operands (halves their VMEM footprint)."""
    if single_buffer and hasattr(pl, "Buffered"):
        try:
            return pl.BlockSpec(shape, index_map, pipeline_mode=pl.Buffered(1))
        except TypeError:
            pass
    return pl.BlockSpec(shape, index_map)


def _footprint_bytes(tm, tn, tk, k_tiles, C, act_bytes, w_bytes, out_bytes):
    n_whh = 1 if k_tiles == 1 else 2     # single-buffered when index-invariant
    return (2 * tm * C * act_bytes       # x tile (double-buffered)
            + 2 * tm * tk * act_bytes    # h tile (double-buffered)
            + 1 * C * tn * w_bytes       # W_ih tile (single-buffered)
            + n_whh * tk * tn * w_bytes  # W_hh tile
            + 2 * tn * 4                 # folded bias
            + 2 * tm * tn * out_bytes    # output tile (double-buffered)
            + tm * tn * 4)               # f32 accumulator scratch


def _batch_tiling(B):
    if B <= 256:
        return B, B                      # one batch tile, no wrapper-side pad
    Bp = _round_up(B, 8)
    for tm in (512, 256, 128, 64, 32, 16, 8):
        if Bp % tm == 0:
            return Bp, tm
    return Bp, 8


def _select_tiles(B, C, H, Hp, act_bytes, w_bytes, out_bytes, budget):
    Bp, tm = _batch_tiling(B)

    def fits(tn, tk, k_tiles):
        return _footprint_bytes(tm, tn, tk, k_tiles, C,
                                act_bytes, w_bytes, out_bytes) <= budget

    tn_cands, seen = [], set()
    for c in (Hp, 1024, 512, 256, 128):
        if c <= Hp and Hp % c == 0 and c not in seen:
            tn_cands.append(c)
            seen.add(c)

    # Prefer no K tiling at the biggest lane width that fits the VMEM budget.
    for tn in tn_cands:
        if fits(tn, H, 1):
            return Bp, tm, tn, H, 1

    # Otherwise tile the hidden (contraction) axis in multiples of 128.
    tk_cands = [c for c in (2048, 1024, 512, 256, 128) if c < H and H % c == 0]
    for tn in tn_cands:
        for tk in tk_cands:
            if fits(tn, tk, H // tk):
                return Bp, tm, tn, tk, H // tk

    # Fallback: smallest expressible tiles.
    # TODO(synk): if H has no 128-multiple divisor and still doesn't fit, a
    # ragged-K path would be needed; keep K untiled in that case.
    if tk_cands:
        return Bp, tm, tn_cands[-1], tk_cands[-1], H // tk_cands[-1]
    return Bp, tm, tn_cands[-1], H, 1


def _rnn_cell_kernel(x_ref, h_ref, w_ih_ref, w_hh_ref, b_ref, o_ref, acc_ref,
                     *, non_linearity: str, compute_dtype):
    k = pl.program_id(2)

    @pl.when(k == 0)
    def _():
        # x's block index is invariant along k, so it is DMA'd once per
        # (batch, H-out) tile and its matmul only runs on the first K step.
        acc_ref[...] = jnp.dot(x_ref[...].astype(compute_dtype), w_ih_ref[...],
                               preferred_element_type=jnp.float32)

    acc_ref[...] += jnp.dot(h_ref[...].astype(compute_dtype), w_hh_ref[...],
                            preferred_element_type=jnp.float32)

    @pl.when(k == pl.num_programs(2) - 1)
    def _():
        pre = acc_ref[...] + b_ref[...]            # f32 bias add (VPU)
        if non_linearity == "tanh":
            act = jnp.tanh(pre)                    # EUP
        else:
            act = jax.nn.sigmoid(pre)              # EUP
        o_ref[...] = act.astype(o_ref.dtype)


def prepare_params(w_ih_t, w_hh_t, b_ih, b_hh, *, compute_dtype=jnp.bfloat16):
    """One-time parameter prep: pad the output dim to a lane-dense multiple of
    128, fold the two biases, cast weights to the compute dtype (bf16 default:
    halves weight HBM bytes, bf16 MXU path; bias and accumulation stay f32)."""
    C, H = w_ih_t.shape
    Hp = _round_up(H, 128)
    pad = ((0, 0), (0, Hp - H))
    w_ih = jnp.pad(w_ih_t, pad).astype(compute_dtype)
    w_hh = jnp.pad(w_hh_t, pad).astype(compute_dtype)
    b = jnp.pad(b_ih + b_hh, pad).astype(jnp.float32)
    return w_ih, w_hh, b


def rnn_cell(x, h, w_ih, w_hh, b, *, non_linearity: str):
    """x: (B, C), h: (B, H), w_ih: (C, Hp), w_hh: (H, Hp), b: (1, Hp).
    Returns act(x @ W_ih + h @ W_hh + b)[:, :H] of shape (B, H) in x.dtype."""
    if non_linearity not in ("tanh", "sigmoid"):
        raise ValueError("The non linearity is not well specified")
    B, C = x.shape
    H = h.shape[1]
    Hp = w_ih.shape[1]
    assert h.shape[0] == B
    assert w_ih.shape[0] == C and w_hh.shape == (H, Hp)
    assert b.shape == (1, Hp) and Hp % 128 == 0

    act_bytes = x.dtype.itemsize
    w_bytes = w_ih.dtype.itemsize
    out_bytes = x.dtype.itemsize

    capacity = _vmem_capacity_bytes()
    budget = int(0.70 * capacity)
    Bp, tm, tn, tk, k_tiles = _select_tiles(B, C, H, Hp, act_bytes, w_bytes,
                                            out_bytes, budget)

    # No [x, h] concat; batch padding only if the batch axis is tiled and
    # ragged (rare, large batches only).
    if Bp != B:
        x = jnp.pad(x, ((0, Bp - B), (0, 0)))
        h = jnp.pad(h, ((0, Bp - B), (0, 0)))

    fp = _footprint_bytes(tm, tn, tk, k_tiles, C, act_bytes, w_bytes, out_bytes)
    vmem_limit = int(min(0.90 * capacity, max(1.5 * fp + (2 << 20), 16 << 20)))

    kernel = functools.partial(_rnn_cell_kernel,
                               non_linearity=non_linearity,
                               compute_dtype=w_ih.dtype)

    # H-out tiles lead (disjoint weight halves per v7x TensorCore), batch
    # tiles next (weights stay VMEM-resident across them), reduction last.
    grid = (Hp // tn, Bp // tm, k_tiles)

    out = pl.pallas_call(
        kernel,
        out_shape=jax.ShapeDtypeStruct((Bp, Hp), x.dtype),
        grid=grid,
        in_specs=[
            pl.BlockSpec((tm, C), lambda j, i, k: (i, 0)),            # x
            pl.BlockSpec((tm, tk), lambda j, i, k: (i, k)),           # h
            _block_spec((C, tn), lambda j, i, k: (0, j),
                        single_buffer=True),                          # W_ih
            _block_spec((tk, tn), lambda j, i, k: (k, j),
                        single_buffer=(k_tiles == 1)),                # W_hh
            _block_spec((1, tn), lambda j, i, k: (0, j),
                        single_buffer=True),                          # bias
        ],
        out_specs=pl.BlockSpec((tm, tn), lambda j, i, k: (i, j)),
        scratch_shapes=[pltpu.VMEM((tm, tn), jnp.float32)],
        compiler_params=pltpu.CompilerParams(
            dimension_semantics=("parallel", "parallel", "arbitrary"),
            vmem_limit_bytes=vmem_limit),
    )(x, h, w_ih, w_hh, b)

    if Bp != B or Hp != H:
        # TODO(synk): when this cell is scanned over time, carry the hidden
        # state in its padded (Bp, Hp) layout so this slice (and the pad
        # above) move outside the scan.
        out = out[:B, :H]
    return out


def init_params(key, input_channels, hidden_channels):
    """Deterministic init mimicking torch.nn.Linear (uniform +/- 1/sqrt(fan_in))."""
    k1, k2, k3, k4 = jax.random.split(key, 4)
    bound_ih = 1.0 / jnp.sqrt(jnp.float32(input_channels))
    bound_hh = 1.0 / jnp.sqrt(jnp.float32(hidden_channels))
    # Stored already transposed: (in_features, out_features).
    w_ih_t = jax.random.uniform(k1, (input_channels, hidden_channels),
                                jnp.float32, -bound_ih, bound_ih)
    b_ih = jax.random.uniform(k2, (1, hidden_channels),
                              jnp.float32, -bound_ih, bound_ih)
    w_hh_t = jax.random.uniform(k3, (hidden_channels, hidden_channels),
                                jnp.float32, -bound_hh, bound_hh)
    b_hh = jax.random.uniform(k4, (1, hidden_channels),
                              jnp.float32, -bound_hh, bound_hh)
    return w_ih_t, w_hh_t, b_ih, b_hh


def rnn_cell_reference(x, h, w_ih_t, w_hh_t, b_ih, b_hh, non_linearity):
    pre = h @ w_hh_t + b_hh + x @ w_ih_t + b_ih
    return jnp.tanh(pre) if non_linearity == "tanh" else jax.nn.sigmoid(pre)


if __name__ == "__main__":
    batch = 8
    input_channels = 16
    hidden_channels = 32
    non_linearity = "sigmoid"   # the case torch.nn.RNNCell can't do

    key = jax.random.PRNGKey(0)
    kx, kh, kp = jax.random.split(key, 3)
    x = jax.random.normal(kx, (batch, input_channels), jnp.float32)
    h = jax.random.normal(kh, (batch, hidden_channels), jnp.float32)
    w_ih_t, w_hh_t, b_ih, b_hh = init_params(kp, input_channels, hidden_channels)

    ref = rnn_cell_reference(x, h, w_ih_t, w_hh_t, b_ih, b_hh, non_linearity)

    # Exact f32 compute path (parity with the f32 reference / torch module).
    w_ih32, w_hh32, b32 = prepare_params(w_ih_t, w_hh_t, b_ih, b_hh,
                                         compute_dtype=jnp.float32)
    out = rnn_cell(x, h, w_ih32, w_hh32, b32, non_linearity=non_linearity)
    out = jax.block_until_ready(out)
    assert out.shape == (batch, hidden_channels)
    assert jnp.allclose(out, ref, atol=1e-5, rtol=1e-5)

    # Default bf16 weight/activation path (f32 bias + f32 MXU accumulation).
    w_ih16, w_hh16, b16 = prepare_params(w_ih_t, w_hh_t, b_ih, b_hh)
    out_bf16 = rnn_cell(x, h, w_ih16, w_hh16, b16, non_linearity=non_linearity)
    out_bf16 = jax.block_until_ready(out_bf16)
    assert out_bf16.shape == (batch, hidden_channels)
    assert jnp.allclose(out_bf16, ref, atol=3e-2, rtol=3e-2)

    print("KERNEL_OK")
</pallas_src>

<mosaic_0001>
module attributes {stable_mosaic.version = 11 : i64} {
  func.func @_rnn_cell_kernel(%arg0: i32, %arg1: i32, %arg2: i32, %arg3: memref<8x16xf32, #tpu.memory_space<vmem>>, %arg4: memref<8x32xf32, #tpu.memory_space<vmem>>, %arg5: memref<16x128xf32, #tpu.memory_space<vmem>>, %arg6: memref<32x128xf32, #tpu.memory_space<vmem>>, %arg7: memref<1x128xf32, #tpu.memory_space<vmem>>, %arg8: memref<8x128xf32, #tpu.memory_space<vmem>>, %arg9: memref<8x128xf32, #tpu.memory_space<vmem>>) attributes {dimension_semantics = [#tpu.dimension_semantics<parallel>, #tpu.dimension_semantics<parallel>, #tpu.dimension_semantics<arbitrary>], iteration_bounds = array<i64: 1, 1, 1>, scalar_prefetch = 0 : i64, scratch_operands = 1 : i64, tpu.core_type = #tpu.core_type<tc>, window_params = [{transform_indices = @transform_0, window_bounds = array<i64: 8, 16>}, {transform_indices = @transform_1, window_bounds = array<i64: 8, 32>}, {pipeline_mode = #tpu.pipeline_mode<synchronous>, transform_indices = @transform_2, window_bounds = array<i64: 16, 128>}, {pipeline_mode = #tpu.pipeline_mode<synchronous>, transform_indices = @transform_3, window_bounds = array<i64: 32, 128>}, {pipeline_mode = #tpu.pipeline_mode<synchronous>, transform_indices = @transform_4, window_bounds = array<i64: 1, 128>}, {transform_indices = @transform_5, window_bounds = array<i64: 8, 128>}]} {
    %c0_i32 = arith.constant 0 : i32
    %0 = arith.cmpi eq, %arg2, %c0_i32 : i32
    %1 = arith.extui %0 : i1 to i32
    %c0_i32_0 = arith.constant 0 : i32
    %2 = arith.cmpi ne, %1, %c0_i32_0 : i32
    scf.if %2 {
      %c0_10 = arith.constant 0 : index
      %c0_11 = arith.constant 0 : index
      %12 = vector.load %arg3[%c0_10, %c0_11] : memref<8x16xf32, #tpu.memory_space<vmem>>, vector<8x16xf32>
      %c0_12 = arith.constant 0 : index
      %c0_13 = arith.constant 0 : index
      %13 = vector.load %arg5[%c0_12, %c0_13] : memref<16x128xf32, #tpu.memory_space<vmem>>, vector<16x128xf32>
      %cst_14 = arith.constant dense<0.000000e+00> : vector<8x128xf32>
      %14 = tpu.matmul %12, %13, %cst_14 {dimension_numbers = #tpu.dot_dimension_numbers<[1], [0], [0], [1], [0, 0, 1, 1], [], []>} : vector<8x16xf32>, vector<16x128xf32>, vector<8x128xf32> -> vector<8x128xf32>
      %c0_15 = arith.constant 0 : index
      %c0_16 = arith.constant 0 : index
      %15 = vector.load %arg9[%c0_15, %c0_16] : memref<8x128xf32, #tpu.memory_space<vmem>>, vector<8x128xf32>
      tpu.vector_store %arg9[%c0_15, %c0_16], %14 {strides = array<i32>} : memref<8x128xf32, #tpu.memory_space<vmem>>, vector<8x128xf32>,
    } else {
    }
    %c0 = arith.constant 0 : index
    %c0_1 = arith.constant 0 : index
    %3 = vector.load %arg9[%c0, %c0_1] : memref<8x128xf32, #tpu.memory_space<vmem>>, vector<8x128xf32>
    %c0_2 = arith.constant 0 : index
    %c0_3 = arith.constant 0 : index
    %4 = vector.load %arg4[%c0_2, %c0_3] : memref<8x32xf32, #tpu.memory_space<vmem>>, vector<8x32xf32>
    %c0_4 = arith.constant 0 : index
    %c0_5 = arith.constant 0 : index
    %5 = vector.load %arg6[%c0_4, %c0_5] : memref<32x128xf32, #tpu.memory_space<vmem>>, vector<32x128xf32>
    %cst = arith.constant dense<0.000000e+00> : vector<8x128xf32>
    %6 = tpu.matmul %4, %5, %cst {dimension_numbers = #tpu.dot_dimension_numbers<[1], [0], [0], [1], [0, 0, 1, 1], [], []>} : vector<8x32xf32>, vector<32x128xf32>, vector<8x128xf32> -> vector<8x128xf32>
    %7 = arith.addf %3, %6 : vector<8x128xf32>
    %c0_6 = arith.constant 0 : index
    %c0_7 = arith.constant 0 : index
    %8 = vector.load %arg9[%c0_6, %c0_7] : memref<8x128xf32, #tpu.memory_space<vmem>>, vector<8x128xf32>
    tpu.vector_store %arg9[%c0_6, %c0_7], %7 {strides = array<i32>} : memref<8x128xf32, #tpu.memory_space<vmem>>, vector<8x128xf32>,
    %c0_i32_8 = arith.constant 0 : i32
    %9 = arith.cmpi eq, %arg2, %c0_i32_8 : i32
    %10 = arith.extui %9 : i1 to i32
    %c0_i32_9 = arith.constant 0 : i32
    %11 = arith.cmpi ne, %10, %c0_i32_9 : i32
    scf.if %11 {
      %c0_10 = arith.constant 0 : index
      %c0_11 = arith.constant 0 : index
      %12 = vector.load %arg9[%c0_10, %c0_11] : memref<8x128xf32, #tpu.memory_space<vmem>>, vector<8x128xf32>
      %c0_12 = arith.constant 0 : index
      %c0_13 = arith.constant 0 : index
      %13 = vector.load %arg7[%c0_12, %c0_13] : memref<1x128xf32, #tpu.memory_space<vmem>>, vector<1x128xf32>
      %14 = vector.broadcast %13 : vector<1x128xf32> to vector<8x128xf32>
      %15 = arith.addf %12, %14 : vector<8x128xf32>
      %16 = arith.negf %15 : vector<8x128xf32>
      %17 = math.exp %16 : vector<8x128xf32>
      %cst_14 = arith.constant 1.000000e+00 : f32
      %18 = vector.broadcast %cst_14 : f32 to vector<8x128xf32>
      %19 = arith.addf %18, %17 : vector<8x128xf32>
      %20 = arith.divf %18, %19 : vector<8x128xf32>
      %c0_15 = arith.constant 0 : index
      %c0_16 = arith.constant 0 : index
      %21 = vector.load %arg8[%c0_15, %c0_16] : memref<8x128xf32, #tpu.memory_space<vmem>>, vector<8x128xf32>
      tpu.vector_store %arg8[%c0_15, %c0_16], %20 {strides = array<i32>} : memref<8x128xf32, #tpu.memory_space<vmem>>, vector<8x128xf32>,
    } else {
    }
    return
  }
  func.func @transform_0(%arg0: i32, %arg1: i32, %arg2: i32) -> (i32, i32) {
    %c0_i32 = arith.constant 0 : i32
    %c0_i32_0 = arith.constant 0 : i32
    return %arg1, %c0_i32 : i32, i32
  }
  func.func @transform_1(%arg0: i32, %arg1: i32, %arg2: i32) -> (i32, i32) {
    %c0_i32 = arith.constant 0 : i32
    return %arg1, %arg2 : i32, i32
  }
  func.func @transform_2(%arg0: i32, %arg1: i32, %arg2: i32) -> (i32, i32) {
    %c0_i32 = arith.constant 0 : i32
    %c0_i32_0 = arith.constant 0 : i32
    return %c0_i32, %arg0 : i32, i32
  }
  func.func @transform_3(%arg0: i32, %arg1: i32, %arg2: i32) -> (i32, i32) {
    %c0_i32 = arith.constant 0 : i32
    return %arg2, %arg0 : i32, i32
  }
  func.func @transform_4(%arg0: i32, %arg1: i32, %arg2: i32) -> (i32, i32) {
    %c0_i32 = arith.constant 0 : i32
    %c0_i32_0 = arith.constant 0 : i32
    return %c0_i32, %arg0 : i32, i32
  }
  func.func @transform_5(%arg0: i32, %arg1: i32, %arg2: i32) -> (i32, i32) {
    %c0_i32 = arith.constant 0 : i32
    return %arg1, %arg0 : i32, i32
  }
}

</mosaic_0001>

<bundles_post_ra>
// kernel: tpu_custom_call.1
= control target key start
LH: loop header
LB: loop body
LE: loop exit
PB: predicated region body
PF: predicated region fallthrough
CT: control target
= control target key end

     0   :  { %10 = vsyncpa [#allocation4], 0  ;;  %s546_s0 = inlined_call_operand.hbm [shape: f32[8,16], index: 0, kind: input, shape index: {}]   ;;  %s547_s1 = inlined_call_operand.hbm [shape: f32[8,32], index: 1, kind: input, shape index: {}]   ;;  %s548_s2 = inlined_call_operand.hbm [shape: f32[16,128], index: 2, kind: input, shape index: {}]   ;;  %s549_s3 = inlined_call_operand.hbm [shape: f32[32,128], index: 3, kind: input, shape index: {}]   ;;  %s550_s4 = inlined_call_operand.vmem [shape: f32[1,128], index: 4, kind: input, shape index: {}]   ;;  %s551_s5 = inlined_call_operand.hbm [shape: f32[8,128], index: 5, kind: output, shape index: {}]  }
   0x1   :  { %11 = vsyncpa [#allocation7], 0 }
   0x2   :  { %12 = vsyncpa [#allocation10], 0 }
   0x3   :  { %13 = vsyncpa [#allocation5], 0  ;;  %s443_s18 = smov [#allocation6]   ;;  %s444_s20 = smov [#allocation3]  }
   0x4   :  { %s30_s19 = sshll.u32 %s443_s18, 4  ;;  %s20_s21 = sshll.u32 %s444_s20, 4  ;;  %s31_s19 = int_to_ptr.vmem [resolvable:$true] %s30_s19  ;;  %s21_s21 = int_to_ptr.vmem [resolvable:$true] %s20_s21 }
   0x5   :  { %s325_s24 = scalar_lea.hbm %s547_s1, 128 }
   0x6   :  { %p326_p0 = scmp.ne.s32.totalorder %s547_s1, %s325_s24  ;;  %p329_p1 = scmp.lt.u32.totalorder %s325_s24, %s547_s1 }
   0x8   :  { %p331_p2 = pnand %p329_p1, %p326_p0 }
   0xa   :  { %334 = shalt.err (!%p331_p2)
}
   0xb   :  { %s335_s29 = scalar_lea.vmem %s31_s19, 128  ;;  %p340_p4 = scmp.lt.s32.totalorder %s31_s19, %s31_s19 }
   0xc   :  { %p336_p3 = scmp.ne.s32.totalorder %s31_s19, %s335_s29  ;;  %p341_p5 = scmp.lt.s32.totalorder %s335_s29, %s335_s29 }
   0xe   :  { %p342_p6 = por %p341_p5, %p340_p4 }
  0x10   :  { %p343_p7 = pnand %p342_p6, %p336_p3 }
  0x12   :  { %346 = shalt.err (!%p343_p7)
}
  0x13   :  { %33 = dma.hbm_to_vmem [thread:$0]  %s547_s1, 128, %s31_s19, [#allocation7]  }
  0x14   :  { %s347_s9 = scalar_lea.hbm %s546_s0, 128 }
  0x15   :  { %p348_p8 = scmp.ne.s32.totalorder %s546_s0, %s347_s9  ;;  %p351_p9 = scmp.lt.u32.totalorder %s347_s9, %s546_s0 }
  0x17   :  { %p353_p10 = pnand %p351_p9, %p348_p8 }
  0x19   :  { %356 = shalt.err (!%p353_p10)
}
  0x1a   :  { %s357_s14 = scalar_lea.vmem %s21_s21, 128  ;;  %p362_p12 = scmp.lt.s32.totalorder %s21_s21, %s21_s21 }
  0x1b   :  { %p358_p11 = scmp.ne.s32.totalorder %s21_s21, %s357_s14  ;;  %p363_p13 = scmp.lt.s32.totalorder %s357_s14, %s357_s14 }
  0x1d   :  { %p364_p0 = por %p363_p13, %p362_p12 }
  0x1f   :  { %p365_p1 = pnand %p364_p0, %p358_p11 }
  0x21   :  { %368 = shalt.err (!%p365_p1)
}
  0x22   :  { %23 = dma.hbm_to_vmem [thread:$0]  %s546_s0, 128, %s21_s21, [#allocation4]  }
  0x23   :  { %s445_s16 = smov [#allocation8]   ;;  %s369_s20 = scalar_lea.hbm %s548_s2, 256 }
  0x24   :  { %s39_s17 = sshll.u32 %s445_s16, 4  ;;  %p370_p2 = scmp.ne.s32.totalorder %s548_s2, %s369_s20  ;;  %s40_s17 = int_to_ptr.vmem [resolvable:$true] %s39_s17 }
  0x25   :  { %p373_p3 = scmp.lt.u32.totalorder %s369_s20, %s548_s2 }
  0x27   :  { %p375_p4 = pnand %p373_p3, %p370_p2 }
  0x29   :  { %378 = shalt.err (!%p375_p4)
}
  0x2a   :  { %s379_s26 = scalar_lea.vmem %s40_s17, 256  ;;  %p384_p6 = scmp.lt.s32.totalorder %s40_s17, %s40_s17 }
  0x2b   :  { %p380_p5 = scmp.ne.s32.totalorder %s40_s17, %s379_s26  ;;  %p385_p7 = scmp.lt.s32.totalorder %s379_s26, %s379_s26 }
  0x2d   :  { %p386_p8 = por %p385_p7, %p384_p6 }
  0x2f   :  { %p387_p9 = pnand %p386_p8, %p380_p5 }
  0x31   :  { %390 = shalt.err (!%p387_p9)
}
  0x32   :  { %s446_s0 = smov 128   ;;  %s447_s21 = smov 8  }
  0x33   :  { %45 = dma.hbm_to_vmem [thread:$0]  %s548_s2, 256, %s40_s17, [#allocation7], %s446_s0, %s446_s0, %s447_s21  }
  0x34   :  { %s448_s29 = smov [#allocation9]   ;;  %s391_s8 = scalar_lea.hbm %s549_s3, 512 }
  0x35   :  { %s51_s30 = sshll.u32 %s448_s29, 4  ;;  %p392_p10 = scmp.ne.s32.totalorder %s549_s3, %s391_s8  ;;  %s52_s30 = int_to_ptr.vmem [resolvable:$true] %s51_s30 }
  0x36   :  { %p395_p11 = scmp.lt.u32.totalorder %s391_s8, %s549_s3 }
  0x38   :  { %p397_p12 = pnand %p395_p11, %p392_p10 }
  0x3a   :  { %400 = shalt.err (!%p397_p12)
}
  0x3b   :  { %s401_s13 = scalar_lea.vmem %s52_s30, 512  ;;  %p406_p0 = scmp.lt.s32.totalorder %s52_s30, %s52_s30 }
  0x3c   :  { %p402_p13 = scmp.ne.s32.totalorder %s52_s30, %s401_s13  ;;  %p407_p1 = scmp.lt.s32.totalorder %s401_s13, %s401_s13 }
  0x3e   :  { %p408_p2 = por %p407_p1, %p406_p0 }
  0x40   :  { %p409_p3 = pnand %p408_p2, %p402_p13 }
  0x42   :  { %412 = shalt.err (!%p409_p3)
}
  0x43   :  { %57 = dma.hbm_to_vmem [thread:$0]  %s549_s3, 512, %s52_s30, [#allocation10], %s446_s0, %s446_s0, %s447_s21  }
  0x44   :  { %435 = dma.done.wait [#allocation4], 128  }
  0x45   :  { %436 = vsyncadd [#allocation4], 4294967168 }
  0x46   :  { %437 = dma.done.wait [#allocation7], 384  }
  0x47   :  { %438 = vsyncadd [#allocation7], 4294966912 }
  0x48   :  { %439 = dma.done.wait [#allocation10], 512  }
  0x49   :  { %440 = vsyncadd [#allocation10], 4294966784  ;;  %v449_v0 = vmov 0.0|0.0   ;;  %vm450_vm0 = vmmov 0   ;;  %v451_v1 = vmov 0.0   ;;  %v156_v2 = vld [vmem:[#allocation9] sm:$0xff] }
  0x4a   :  { %305 = vmatprep.subr.bf16.mxu1 %v449_v0  ;;  %302 = vmatprep.subr.bf16.mxu0 %v449_v0  ;;  %v157_v3 = vld [vmem:[#allocation9 + $0x8] sm:$0xff]  ;;  %v77_v4 = vld [vmem:[#allocation8] sm:$0xff]  ;;  %v78_v6 = vld [vmem:[#allocation8 + $0x8] sm:$0xff]  ;;  %vm79_vm1 = vcmask 130048   ;;  %vm160_vm2 = vcmask 261120   ;;  %s452_s15 = smov [#allocation11]  }
  0x4b   :  { %288 = vmatprep.mubr.msk.f32.mxu0 %vm450_vm0, %v451_v1  ;;  %299 = vmatprep.mubr.msk.f32.mxu1 %vm450_vm0, %v451_v1  ;;  %v306_v5 = vpack.c.bf16 %v157_v3, %v156_v2  ;;  %v158_v7 = vld [vmem:[#allocation9 + $0x10] sm:$0xff]  ;;  %v159_v8 = vld [vmem:[#allocation9 + $0x18] sm:$0xff]  ;;  %v303_v9 = vpack.c.bf16 %v78_v6, %v77_v4  ;;  %v76_v11 = vld [vmem:[#allocation3] sm:$0xff]  ;;  %s261_s16 = sshll.u32 %s452_s15, 4  ;;  %s262_s16 = int_to_ptr.vmem [resolvable:$true] %s261_s16 }
  0x4c   :  { %v309_v10 = vpack.c.bf16 %v159_v8, %v158_v7  ;;  %v155_v12 = vld [vmem:[#allocation6] sm:$0xff]  ;;  %v274_v16 = vld [vmem:[%s550_s4] ss:$0 sm:$0xff]  ;;  %s413_s17 = scalar_lea.vmem %s262_s16, 128  ;;  %p418_p5 = scmp.lt.s32.totalorder %s262_s16, %s262_s16 }
  0x4d   :  { %307 = vmatpush3.bf16.msra.mxu1 %v306_v5  ;;  %304 = vmatpush3.bf16.msra.mxu0 %v303_v9  ;;  %p414_p4 = scmp.ne.s32.totalorder %s262_s16, %s413_s17  ;;  %p419_p6 = scmp.lt.s32.totalorder %s413_s17, %s413_s17 }
  0x4e   :  { %308 = vmatprep.subr.bf16.mxu1 %v449_v0 }
  0x4f   :  { %p420_p7 = por %p419_p6, %p418_p5 }
  0x50   :  { %289 = vmatmul.mubr.msk.f32.vlgmr.msra.gmra.mrb[0].mxu0 %vm79_vm1, %v76_v11 }
  0x51   :  { %310 = vmatpush3.bf16.msra.mxu1 %v309_v10  ;;  %p421_p8 = pnand %p420_p7, %p414_p4 }
  0x54   :  { %300 = vmatmul.mubr.msk.f32.vlgmr.msra.gmra.mrb[0].mxu1 %vm160_vm2, %v155_v12 }
 0x123   :  { %v149_v13 = vpop.f32.mrb[0].mxu0 }
 0x124   :  { %v290_v14 = vpop.f32.mrb[1].mxu0 }
 0x127   :  { %v230_v15 = vpop.f32.mrb[0].mxu1 }
 0x128   :  { %v234_v17 = vadd.f32 %v230_v15, %v149_v13  ;;  %v301_v18 = vpop.f32.mrb[1].mxu1 }
 0x12a   :  { %v247_v19 = vadd.f32 %v274_v16, %v234_v17 }
 0x12c   :  { %v275_v20 = vmul.f32 -1.442695, %v247_v19 }
 0x12e   :  { %321 = vpow2.f32 %v275_v20 }
 0x138   :  { %v322_v21 = vpop.eup %321 }
 0x139   :  { %v251_v22 = vadd.f32 1.0, %v322_v21 }
 0x13b   :  { %323 = vrcp.f32 %v251_v22 }
 0x145   :  { %v324_v23 = vpop.eup %323 }
 0x146   :  { %254 = vst [vmem:[#allocation11] sm:$0xff] %v324_v23 }
 0x147   :  { %424 = shalt.err (!%p421_p8)
}
 0x148   :  { %s425_s19 = scalar_lea.hbm %s551_s5, 128 }
 0x149   :  { %p426_p9 = scmp.ne.s32.totalorder %s551_s5, %s425_s19  ;;  %p429_p10 = scmp.lt.u32.totalorder %s425_s19, %s551_s5 }
 0x14b   :  { %p431_p11 = pnand %p429_p10, %p426_p9 }
 0x14d   :  { %434 = shalt.err (!%p431_p11)
}
 0x14e   :  { %264 = dma.vmem_to_hbm [thread:$0]  %s262_s16, 128, %s551_s5, [#allocation5]  }
 0x14f   :  { %441 = dma.done.wait [#allocation5], 128  }
 0x150   :  { %442 = vsyncadd [#allocation5], 4294967168 }
 0x151   :  { %268 = vsyncpa [#allocation4], 1 }
 0x152   :  { %269 = vsyncpa [#allocation7], 1 }
 0x153   :  { %270 = vsyncpa [#allocation10], 1 }
 0x154   :  { %271 = vsyncpa [#allocation5], 1 }

</bundles_post_ra>
